<compile_context>
chip_gen: v7x
topology: tpu7x:2x2x1
jax: 0.10.0
libtpu: 0.0.40
codegen_flags: <defaults>
</compile_context>

<pallas_src>
import jax
import jax.numpy as jnp
from jax.experimental import pallas as pl
from jax.experimental.pallas import tpu as pltpu

_CPAD = 8        # class dimension padded to one sublane group
_TB_MAX = 2048   # max batch-tile rows per grid step


def _round_up(v, m):
    return (v + m - 1) // m * m


def _cdiv(a, b):
    return -(-a // b)


def _mlp_kernel(x_ref, w1_ref, b1_ref, w2t_ref, b2t_ref, o_ref):
    """One batch tile: h = relu(x @ W1 + b1);  o^T = W2^T @ h^T + b2^T."""
    mm_dtype = w1_ref.dtype  # bf16 (weights pre-cast in pack_params)

    # Layer 1 on the MXU with f32 accumulation; bias + ReLU in f32 on the VPU.
    h = jnp.dot(
        x_ref[...].astype(mm_dtype),
        w1_ref[...],
        preferred_element_type=jnp.float32,
    )
    h = jnp.maximum(h + b1_ref[...], 0.0)

    # Layer 2, emitted transposed: contract the hidden axis of both operands
    # (w2t is [CPAD, hidden], h is [tb, hidden]) -> (CPAD, tb).  Batch remains
    # on the lane axis so the store below is lane-dense / unmasked and only
    # CPAD rows are written back.
    out_t = jax.lax.dot_general(
        w2t_ref[...],
        h.astype(mm_dtype),
        dimension_numbers=(((1,), (1,)), ((), ())),
        preferred_element_type=jnp.float32,
    )
    o_ref[...] = (out_t + b2t_ref[...]).astype(o_ref.dtype)


def pack_params(w1, b1, w2, b2, matmul_dtype=jnp.bfloat16):
    """One-time parameter prep (do this once, outside the per-step forward).

    w1: [input_size, hidden]   b1: [hidden]
    w2: [hidden, classes]      b2: [classes]
    Returns kernel-layout params: (W1 bf16, b1 [1,H] f32,
                                   W2^T zero-padded to [8,H] bf16, b2^T [8,1] f32).
    """
    input_size, hidden = w1.shape
    classes = w2.shape[1]
    assert classes <= _CPAD, "pad constant _CPAD if you need more classes"

    w1p = w1.astype(matmul_dtype)
    b1p = b1.reshape(1, hidden).astype(jnp.float32)
    w2t = jnp.zeros((_CPAD, hidden), matmul_dtype).at[:classes, :].set(
        w2.T.astype(matmul_dtype))
    b2t = jnp.zeros((_CPAD, 1), jnp.float32).at[:classes, 0].set(
        b2.astype(jnp.float32))
    return (w1p, b1p, w2t, b2t)


def headline_classifier_forward(x, params, num_classes=2):
    """Fused MLP forward (Linear -> ReLU -> Linear).  Returns [batch, num_classes]."""
    w1p, b1p, w2t, b2t = params
    batch, input_size = x.shape
    hidden = w1p.shape[1]

    # ---- Adaptive batch tiling --------------------------------------------
    # * cap tile at _TB_MAX rows, * minimize padding by splitting batch evenly,
    # * force >= 2 steps once batch >= 256 so v7x can use both TensorCores.
    n_steps = max(1, _cdiv(batch, _TB_MAX))
    if batch >= 256:
        n_steps = max(n_steps, 2)
    tb = _round_up(_cdiv(batch, n_steps), 128)   # lane-aligned batch tile
    b_padded = n_steps * tb
    xp = jnp.pad(x, ((0, b_padded - batch), (0, 0))) if b_padded != batch else x

    out_t = pl.pallas_call(
        _mlp_kernel,
        out_shape=jax.ShapeDtypeStruct((_CPAD, b_padded), x.dtype),
        grid_spec=pltpu.PrefetchScalarGridSpec(
            num_scalar_prefetch=0,
            grid=(n_steps,),
            in_specs=[
                pl.BlockSpec((tb, input_size), lambda i: (i, 0)),      # x tiles (pipelined)
                pl.BlockSpec((input_size, hidden), lambda i: (0, 0)),  # W1 (bf16) resident
                pl.BlockSpec((1, hidden), lambda i: (0, 0)),           # b1 (f32) resident
                pl.BlockSpec((_CPAD, hidden), lambda i: (0, 0)),       # W2^T (bf16) resident
                pl.BlockSpec((_CPAD, 1), lambda i: (0, 0)),            # b2^T (f32) resident
            ],
            out_specs=pl.BlockSpec((_CPAD, tb), lambda i: (0, i)),
        ),
        compiler_params=pltpu.CompilerParams(
            # Batch tiles are independent -> megacore sharding on v7x.
            dimension_semantics=("parallel",),
        ),
    )(xp, w1p, b1p, w2t, b2t)

    # Tiny post-kernel fixup: drop padded classes / batch rows, restore [B, C].
    return out_t[:num_classes, :batch].T


def init_params(key, input_size, hidden_size=128, output_classes=2, dtype=jnp.float32):
    """nn.Linear-style uniform(-1/sqrt(fan_in), +1/sqrt(fan_in)) init."""
    k1, k2, k3, k4 = jax.random.split(key, 4)
    bound1 = 1.0 / jnp.sqrt(input_size)
    bound2 = 1.0 / jnp.sqrt(hidden_size)
    w1 = jax.random.uniform(k1, (input_size, hidden_size), dtype, -bound1, bound1)
    b1 = jax.random.uniform(k2, (hidden_size,), dtype, -bound1, bound1)
    w2 = jax.random.uniform(k3, (hidden_size, output_classes), dtype, -bound2, bound2)
    b2 = jax.random.uniform(k4, (output_classes,), dtype, -bound2, bound2)
    return w1, b1, w2, b2


def _reference(x, w1, b1, w2, b2, matmul_dtype=jnp.bfloat16):
    """Pure-JAX reference with the same operand dtypes as the kernel."""
    h = jnp.dot(x.astype(matmul_dtype), w1.astype(matmul_dtype),
                preferred_element_type=jnp.float32)
    h = jnp.maximum(h + b1, 0.0)
    out = jnp.dot(h.astype(matmul_dtype), w2.astype(matmul_dtype),
                  preferred_element_type=jnp.float32)
    return out + b2


if __name__ == "__main__":
    # Small shapes consistent with the module: batch=8, input_size=32, hidden=128, classes=2.
    batch, input_size, hidden_size, output_classes = 8, 32, 128, 2

    key = jax.random.PRNGKey(0)
    kx, kp = jax.random.split(key)
    x = jax.random.normal(kx, (batch, input_size), dtype=jnp.float32)
    w1, b1, w2, b2 = init_params(kp, input_size, hidden_size, output_classes)
    params = pack_params(w1, b1, w2, b2)

    logits = headline_classifier_forward(x, params, output_classes)
    logits = jax.block_until_ready(logits)
    assert logits.shape == (batch, output_classes)

    # Exact-semantics check (same bf16-operand / f32-accumulate math as the kernel).
    ref_matched = _reference(x, w1, b1, w2, b2, jnp.bfloat16)
    assert jnp.allclose(logits, ref_matched, atol=1e-3, rtol=1e-3)

    # Sanity check against the full-f32 module forward (bf16 operand rounding only).
    ref_f32 = jnp.maximum(x @ w1 + b1, 0.0) @ w2 + b2
    assert jnp.allclose(logits, ref_f32, atol=5e-2, rtol=5e-2)

    # Also exercise the multi-step grid path (batch >= 256 -> 2 grid steps).
    xb = jax.random.normal(kx, (300, input_size), dtype=jnp.float32)
    logits_b = jax.block_until_ready(
        headline_classifier_forward(xb, params, output_classes))
    assert logits_b.shape == (300, output_classes)
    assert jnp.allclose(logits_b, _reference(xb, w1, b1, w2, b2, jnp.bfloat16),
                        atol=1e-3, rtol=1e-3)

    print("KERNEL_OK")
</pallas_src>

<mosaic_0001>
module attributes {stable_mosaic.version = 11 : i64} {
  func.func @_mlp_kernel(%arg0: i32, %arg1: memref<128x32xf32, #tpu.memory_space<vmem>>, %arg2: memref<32x128xbf16, #tpu.memory_space<vmem>>, %arg3: memref<1x128xf32, #tpu.memory_space<vmem>>, %arg4: memref<8x128xbf16, #tpu.memory_space<vmem>>, %arg5: memref<8x1xf32, #tpu.memory_space<vmem>>, %arg6: memref<8x128xf32, #tpu.memory_space<vmem>>) attributes {dimension_semantics = [#tpu.dimension_semantics<parallel>], iteration_bounds = array<i64: 1>, scalar_prefetch = 0 : i64, scratch_operands = 0 : i64, tpu.core_type = #tpu.core_type<tc>, window_params = [{transform_indices = @transform_0, window_bounds = array<i64: 128, 32>}, {pipeline_mode = #tpu.pipeline_mode<synchronous>, transform_indices = @transform_1, window_bounds = array<i64: 32, 128>}, {pipeline_mode = #tpu.pipeline_mode<synchronous>, transform_indices = @transform_2, window_bounds = array<i64: 1, 128>}, {pipeline_mode = #tpu.pipeline_mode<synchronous>, transform_indices = @transform_3, window_bounds = array<i64: 8, 128>}, {pipeline_mode = #tpu.pipeline_mode<synchronous>, transform_indices = @transform_4, window_bounds = array<i64: 8, 1>}, {transform_indices = @transform_5, window_bounds = array<i64: 8, 128>}]} {
    %c0 = arith.constant 0 : index
    %c0_0 = arith.constant 0 : index
    %0 = vector.load %arg1[%c0, %c0_0] : memref<128x32xf32, #tpu.memory_space<vmem>>, vector<128x32xf32>
    %1 = arith.truncf %0 : vector<128x32xf32> to vector<128x32xbf16>
    %c0_1 = arith.constant 0 : index
    %c0_2 = arith.constant 0 : index
    %2 = vector.load %arg2[%c0_1, %c0_2] : memref<32x128xbf16, #tpu.memory_space<vmem>>, vector<32x128xbf16>
    %cst = arith.constant dense<0.000000e+00> : vector<128x128xf32>
    %3 = tpu.matmul %1, %2, %cst {dimension_numbers = #tpu.dot_dimension_numbers<[1], [0], [0], [1], [0, 0, 1, 1], [], []>} : vector<128x32xbf16>, vector<32x128xbf16>, vector<128x128xf32> -> vector<128x128xf32>
    %c0_3 = arith.constant 0 : index
    %c0_4 = arith.constant 0 : index
    %4 = vector.load %arg3[%c0_3, %c0_4] : memref<1x128xf32, #tpu.memory_space<vmem>>, vector<1x128xf32>
    %5 = vector.broadcast %4 : vector<1x128xf32> to vector<128x128xf32>
    %6 = arith.addf %3, %5 : vector<128x128xf32>
    %cst_5 = arith.constant 0.000000e+00 : f32
    %7 = vector.broadcast %cst_5 : f32 to vector<128x128xf32>
    %8 = arith.maximumf %6, %7 : vector<128x128xf32>
    %c0_6 = arith.constant 0 : index
    %c0_7 = arith.constant 0 : index
    %9 = vector.load %arg4[%c0_6, %c0_7] : memref<8x128xbf16, #tpu.memory_space<vmem>>, vector<8x128xbf16>
    %10 = arith.truncf %8 : vector<128x128xf32> to vector<128x128xbf16>
    %cst_8 = arith.constant dense<0.000000e+00> : vector<8x128xf32>
    %11 = tpu.matmul %9, %10, %cst_8 {dimension_numbers = #tpu.dot_dimension_numbers<[1], [1], [0], [0], [0, 0, 1, 0], [], []>} : vector<8x128xbf16>, vector<128x128xbf16>, vector<8x128xf32> -> vector<8x128xf32>
    %c0_9 = arith.constant 0 : index
    %c0_10 = arith.constant 0 : index
    %12 = vector.load %arg5[%c0_9, %c0_10] : memref<8x1xf32, #tpu.memory_space<vmem>>, vector<8x1xf32>
    %13 = vector.broadcast %12 : vector<8x1xf32> to vector<8x128xf32>
    %14 = arith.addf %11, %13 : vector<8x128xf32>
    %c0_11 = arith.constant 0 : index
    %c0_12 = arith.constant 0 : index
    %15 = vector.load %arg6[%c0_11, %c0_12] : memref<8x128xf32, #tpu.memory_space<vmem>>, vector<8x128xf32>
    tpu.vector_store %arg6[%c0_11, %c0_12], %14 {strides = array<i32>} : memref<8x128xf32, #tpu.memory_space<vmem>>, vector<8x128xf32>,
    return
  }
  func.func @transform_0(%arg0: i32) -> (i32, i32) {
    %c0_i32 = arith.constant 0 : i32
    %c0_i32_0 = arith.constant 0 : i32
    return %arg0, %c0_i32 : i32, i32
  }
  func.func @transform_1(%arg0: i32) -> (i32, i32) {
    %c0_i32 = arith.constant 0 : i32
    %c0_i32_0 = arith.constant 0 : i32
    %c0_i32_1 = arith.constant 0 : i32
    return %c0_i32, %c0_i32_0 : i32, i32
  }
  func.func @transform_2(%arg0: i32) -> (i32, i32) {
    %c0_i32 = arith.constant 0 : i32
    %c0_i32_0 = arith.constant 0 : i32
    %c0_i32_1 = arith.constant 0 : i32
    return %c0_i32, %c0_i32_0 : i32, i32
  }
  func.func @transform_3(%arg0: i32) -> (i32, i32) {
    %c0_i32 = arith.constant 0 : i32
    %c0_i32_0 = arith.constant 0 : i32
    %c0_i32_1 = arith.constant 0 : i32
    return %c0_i32, %c0_i32_0 : i32, i32
  }
  func.func @transform_4(%arg0: i32) -> (i32, i32) {
    %c0_i32 = arith.constant 0 : i32
    %c0_i32_0 = arith.constant 0 : i32
    %c0_i32_1 = arith.constant 0 : i32
    return %c0_i32, %c0_i32_0 : i32, i32
  }
  func.func @transform_5(%arg0: i32) -> (i32, i32) {
    %c0_i32 = arith.constant 0 : i32
    %c0_i32_0 = arith.constant 0 : i32
    return %c0_i32, %arg0 : i32, i32
  }
}

</mosaic_0001>

<bundles_post_ra>
// kernel: tpu_custom_call.1
= control target key start
LH: loop header
LB: loop body
LE: loop exit
PB: predicated region body
PF: predicated region fallthrough
CT: control target
= control target key end

     0   :  { %vm69_vm0 = vcmask 261120   ;;  %s504_s0 = inlined_call_operand.vmem [shape: f32[128,32], index: 0, kind: input, shape index: {}]   ;;  %s505_s1 = inlined_call_operand.vmem [shape: bf16[32,128], index: 1, kind: input, shape index: {}]   ;;  %s506_s2 = inlined_call_operand.vmem [shape: f32[1,128], index: 2, kind: input, shape index: {}]   ;;  %s507_s3 = inlined_call_operand.vmem [shape: bf16[8,128], index: 3, kind: input, shape index: {}]   ;;  %s508_s4 = inlined_call_operand.vmem [shape: f32[8,1], index: 4, kind: input, shape index: {}]   ;;  %s509_s5 = inlined_call_operand.hbm [shape: f32[8,128], index: 5, kind: output, shape index: {}]  }
   0x1   :  { %v352_v0 = vld [vmem:[%s505_s1] sm:$0xff]   ;;  %v353_v1 = vld [vmem:[%s505_s1 + $0x8] sm:$0xff]   ;;  %v24_v5 = vld [vmem:[%s504_s0 + $0x10] sm:$0xff] }
   0x2   :  { %307 = vmatprep.subr.bf16.mxu0 %v352_v0  ;;  %v22_v2 = vld [vmem:[%s504_s0] sm:$0xff]  ;;  %v23_v3 = vld [vmem:[%s504_s0 + $0x8] sm:$0xff]  ;;  %v25_v6 = vld [vmem:[%s504_s0 + $0x18] sm:$0xff] }
   0x3   :  { %308 = vmatpush3.bf16.msra.mxu0 %v352_v0  ;;  %v38_v4 = vpack.c.bf16 %v23_v3, %v22_v2  ;;  %v26_v7 = vld [vmem:[%s504_s0 + $0x20] sm:$0xff]  ;;  %v27_v8 = vld [vmem:[%s504_s0 + $0x28] sm:$0xff]  ;;  %v39_v9 = vpack.c.bf16 %v25_v6, %v24_v5 }
   0x4   :  { %309 = vmatprep.subr.bf16.mxu0 %v353_v1  ;;  %v40_v10 = vpack.c.bf16 %v27_v8, %v26_v7 }
   0x5   :  { %311 = vmatprep.mubr.msk.bf16.mxu0 %vm69_vm0, %v38_v4 }
   0x7   :  { %310 = vmatpush3.bf16.msra.mxu0 %v353_v1 }
   0x8   :  { %10 = vsyncpa [#allocation3], 0  ;;  %v28_v11 = vld [vmem:[%s504_s0 + $0x30] sm:$0xff]  ;;  %v29_v12 = vld [vmem:[%s504_s0 + $0x38] sm:$0xff]  ;;  %v378_v26 = vmov 0.0   ;;  %vm379_vm1 = vmmov 0  }
   0x9   :  { %v30_v13 = vld [vmem:[%s504_s0 + $0x40] sm:$0xff]  ;;  %v31_v14 = vld [vmem:[%s504_s0 + $0x48] sm:$0xff]  ;;  %v41_v15 = vpack.c.bf16 %v29_v12, %v28_v11  ;;  %v32_v17 = vld [vmem:[%s504_s0 + $0x50] sm:$0xff]  ;;  %327 = vmatprep.subr.bf16.mxu1 %v378_v26  ;;  %343 = vmatprep.mubr.msk.bf16.mxu1 %vm379_vm1, %v378_v26  ;;  %v380_v28 = vmov 0  }
   0xa   :  { %312 = vmatmul.mubr.msk.bf16.vlgmr.msra.gmra.mrb[0].mxu0 %vm69_vm0, %v39_v9  ;;  %v42_v16 = vpack.c.bf16 %v31_v14, %v30_v13  ;;  %v33_v18 = vld [vmem:[%s504_s0 + $0x58] sm:$0xff]  ;;  %v34_v19 = vld [vmem:[%s504_s0 + $0x60] sm:$0xff]  ;;  %v35_v20 = vld [vmem:[%s504_s0 + $0x68] sm:$0xff]  ;;  %351 = vset.pattern.permute.xlu0 %v380_v28 }
   0xb   :  { %315 = vmatprep.mubr.msk.bf16.mxu0 %vm69_vm0, %v40_v10  ;;  %v43_v21 = vpack.c.bf16 %v33_v18, %v32_v17  ;;  %v44_v22 = vpack.c.bf16 %v35_v20, %v34_v19  ;;  %v36_v23 = vld [vmem:[%s504_s0 + $0x70] sm:$0xff]  ;;  %v37_v24 = vld [vmem:[%s504_s0 + $0x78] sm:$0xff]  ;;  %v216_v27 = vld [vmem:[%s508_s4] sm:$0xff]  ;;  %s381_s4 = smov [#allocation2]  }
   0xc   :  { %v45_v25 = vpack.c.bf16 %v37_v24, %v36_v23  ;;  %219 = vperm.xlu0 %351, %v216_v27   ;;  %v277_v29 = vld [vmem:[%s506_s2] ss:$0 sm:$0xff]  ;;  %s269_s6 = sshll.u32 %s381_s4, 4  ;;  %s270_s6 = int_to_ptr.vmem [resolvable:$true] %s269_s6 }
   0xd   :  { %s354_s7 = scalar_lea.vmem %s270_s6, 128  ;;  %p359_p1 = scmp.lt.s32.totalorder %s270_s6, %s270_s6 }
   0xe   :  { %p355_p0 = scmp.ne.s32.totalorder %s270_s6, %s354_s7  ;;  %p360_p2 = scmp.lt.s32.totalorder %s354_s7, %s354_s7 }
  0x10   :  { %p361_p3 = por %p360_p2, %p359_p1 }
  0x12   :  { %316 = vmatmul.mubr.msk.bf16.gmra.mrb[4].mxu0 %vm69_vm0, %v41_v15  ;;  %p362_p4 = pnand %p361_p3, %p355_p0 }
  0x13   :  { %319 = vmatprep.mubr.msk.bf16.mxu0 %vm69_vm0, %v42_v16 }
  0x1a   :  { %320 = vmatmul.mubr.msk.bf16.gmra.mrb[8].mxu0 %vm69_vm0, %v43_v21 }
  0x1b   :  { %323 = vmatprep.mubr.msk.bf16.mxu0 %vm69_vm0, %v44_v22  ;;  %v207_v22 = vld [vmem:[%s507_s3] sm:$0xf] }
  0x22   :  { %324 = vmatmul.mubr.msk.bf16.gmra.mrb[12].mxu0 %vm69_vm0, %v45_v25 }
  0x8b   :  { %v220_v23 = vpop.permute.xlu0 %219 }
  0xdd   :  { %v313_v30 = vpop.f32.mrb[0].mxu0 }
  0xde   :  { %v137_v31 = vadd.f32 %v313_v30, %v277_v29  ;;  %v128_v32 = vpop.f32.mrb[1].mxu0 }
  0xdf   :  { %v129_v33 = vadd.f32 %v277_v29, %v128_v32  ;;  %v314_v34 = vpop.f32.mrb[2].mxu0 }
  0xe0   :  { %v140_v35 = vadd.f32 %v314_v34, %v277_v29  ;;  %v131_v36 = vpop.f32.mrb[3].mxu0  ;;  %v193_v38 = vmax.f32 %v137_v31, 0.0 }
  0xe1   :  { %v132_v37 = vadd.f32 %v277_v29, %v131_v36  ;;  %v191_v40 = vmax.f32 %v129_v33, 0.0 }
  0xe2   :  { %v194_v39 = vmax.f32 %v140_v35, 0.0 }
  0xe3   :  { %v192_v41 = vmax.f32 %v132_v37, 0.0 }
  0xe4   :  { %v209_v42 = vpack.c.bf16 %v194_v39, %v193_v38 }
  0xe5   :  { %v208_v43 = vpack.c.bf16 %v192_v41, %v191_v40  ;;  %v317_v44 = vpop.f32.mrb[4].mxu0 }
  0xe6   :  { %v153_v45 = vadd.f32 %v317_v44, %v277_v29  ;;  %v144_v46 = vpop.f32.mrb[5].mxu0 }
  0xe7   :  { %328 = vmatpush3.bf16.xpose.msra.mxu1 %v208_v43  ;;  %v145_v47 = vadd.f32 %v277_v29, %v144_v46  ;;  %v318_v48 = vpop.f32.mrb[6].mxu0 }
  0xe8   :  { %v197_v49 = vmax.f32 %v153_v45, 0.0  ;;  %v156_v50 = vadd.f32 %v318_v48, %v277_v29  ;;  %v147_v51 = vpop.f32.mrb[7].mxu0  ;;  %329 = vmatprep.subr.bf16.mxu1 %v378_v26 }
  0xe9   :  { %v195_v52 = vmax.f32 %v145_v47, 0.0  ;;  %v148_v53 = vadd.f32 %v277_v29, %v147_v51 }
  0xea   :  { %v198_v54 = vmax.f32 %v156_v50, 0.0 }
  0xeb   :  { %v196_v55 = vmax.f32 %v148_v53, 0.0 }
  0xec   :  { %v211_v56 = vpack.c.bf16 %v198_v54, %v197_v49 }
  0xed   :  { %v210_v57 = vpack.c.bf16 %v196_v55, %v195_v52  ;;  %v321_v58 = vpop.f32.mrb[8].mxu0 }
  0xee   :  { %v169_v59 = vadd.f32 %v321_v58, %v277_v29  ;;  %v160_v60 = vpop.f32.mrb[9].mxu0 }
  0xef   :  { %330 = vmatpush3.bf16.xpose.msra.mxu1 %v209_v42  ;;  %v161_v61 = vadd.f32 %v277_v29, %v160_v60  ;;  %v322_v62 = vpop.f32.mrb[10].mxu0 }
  0xf0   :  { %331 = vmatprep.subr.bf16.mxu1 %v378_v26  ;;  %v201_v63 = vmax.f32 %v169_v59, 0.0  ;;  %v172_v0 = vadd.f32 %v322_v62, %v277_v29  ;;  %v163_v1 = vpop.f32.mrb[11].mxu0 }
  0xf1   :  { %v199_v2 = vmax.f32 %v161_v61, 0.0  ;;  %v164_v3 = vadd.f32 %v277_v29, %v163_v1 }
  0xf2   :  { %v202_v4 = vmax.f32 %v172_v0, 0.0 }
  0xf3   :  { %v200_v5 = vmax.f32 %v164_v3, 0.0 }
  0xf4   :  { %v213_v6 = vpack.c.bf16 %v202_v4, %v201_v63 }
  0xf5   :  { %v212_v7 = vpack.c.bf16 %v200_v5, %v199_v2  ;;  %v325_v8 = vpop.f32.mrb[12].mxu0 }
  0xf6   :  { %v185_v9 = vadd.f32 %v325_v8, %v277_v29  ;;  %v176_v10 = vpop.f32.mrb[13].mxu0 }
  0xf7   :  { %332 = vmatpush3.bf16.xpose.msra.mxu1 %v210_v57  ;;  %v177_v11 = vadd.f32 %v277_v29, %v176_v10  ;;  %v326_v12 = vpop.f32.mrb[14].mxu0 }
  0xf8   :  { %333 = vmatprep.subr.bf16.mxu1 %v378_v26  ;;  %v205_v13 = vmax.f32 %v185_v9, 0.0  ;;  %v188_v14 = vadd.f32 %v326_v12, %v277_v29  ;;  %v179_v15 = vpop.f32.mrb[15].mxu0 }
  0xf9   :  { %v203_v16 = vmax.f32 %v177_v11, 0.0  ;;  %v180_v17 = vadd.f32 %v277_v29, %v179_v15 }
  0xfa   :  { %v206_v18 = vmax.f32 %v188_v14, 0.0 }
  0xfb   :  { %v204_v19 = vmax.f32 %v180_v17, 0.0 }
  0xfc   :  { %v215_v20 = vpack.c.bf16 %v206_v18, %v205_v13 }
  0xfd   :  { %v214_v21 = vpack.c.bf16 %v204_v19, %v203_v16 }
  0xff   :  { %334 = vmatpush3.bf16.xpose.msra.mxu1 %v211_v56 }
 0x100   :  { %335 = vmatprep.subr.bf16.mxu1 %v378_v26 }
 0x107   :  { %336 = vmatpush3.bf16.xpose.msra.mxu1 %v212_v7 }
 0x108   :  { %337 = vmatprep.subr.bf16.mxu1 %v378_v26 }
 0x10f   :  { %338 = vmatpush3.bf16.xpose.msra.mxu1 %v213_v6 }
 0x110   :  { %339 = vmatprep.subr.bf16.mxu1 %v378_v26 }
 0x117   :  { %340 = vmatpush3.bf16.xpose.msra.mxu1 %v214_v21 }
 0x118   :  { %341 = vmatprep.subr.bf16.mxu1 %v378_v26 }
 0x11f   :  { %342 = vmatpush3.bf16.xpose.msra.mxu1 %v215_v20 }
 0x126   :  { %344 = vmatmul.mubr.bf16.vlgmr.msra.gmra.mrb[0].mxu1 %v207_v22 }
 0x1f9   :  { %v256_v24 = vpop.f32.mrb[0].mxu1 }
 0x1fa   :  { %v257_v25 = vadd.f32 %v256_v24, %v220_v23  ;;  %v345_v27 = vpop.f32.mrb[1].mxu1 }
 0x1fb   :  { %v259_v28 = vpop.f32.mrb[2].mxu1 }
 0x1fc   :  { %262 = vst [vmem:[#allocation2] sm:$0xff] %v257_v25  ;;  %v346_v29 = vpop.f32.mrb[3].mxu1 }
 0x1fd   :  { %365 = shalt.err (!%p362_p4)
}
 0x1fe   :  { %s366_s9 = scalar_lea.hbm %s509_s5, 128 }
 0x1ff   :  { %p367_p5 = scmp.ne.s32.totalorder %s509_s5, %s366_s9  ;;  %p370_p6 = scmp.lt.u32.totalorder %s366_s9, %s509_s5 }
 0x201   :  { %p372_p7 = pnand %p370_p6, %p367_p5 }
 0x203   :  { %375 = shalt.err (!%p372_p7)
}
 0x204   :  { %272 = dma.vmem_to_hbm [thread:$0]  %s270_s6, 128, %s509_s5, [#allocation3]  }
 0x205   :  { %376 = dma.done.wait [#allocation3], 128  }
 0x206   :  { %377 = vsyncadd [#allocation3], 4294967168 }
 0x207   :  { %276 = vsyncpa [#allocation3], 1 }

</bundles_post_ra>
